<compile_context>
chip_gen: v7x
topology: tpu7x:2x2x1
jax: 0.10.0
libtpu: 0.0.40
codegen_flags: <defaults>
</compile_context>

<pallas_src>
import functools

import jax
import jax.numpy as jnp
import numpy as np
from jax.experimental import pallas as pl
from jax.experimental.pallas import tpu as pltpu


def _round_up(n, m):
    return ((n + m - 1) // m) * m


def _auto_bm(B):
    """Largest useful batch tile.

    Big tiles amortize per-grid-step overhead; keep >= 2 tiles when the batch
    allows so v7x's 2 TensorCores both get work from the "parallel" axis.
    """
    if B >= 16:
        return min(512, _round_up((B + 1) // 2, 8))
    return _round_up(max(B, 1), 8)


def _fused_mlp_kernel(*refs, n_layers):
    # refs = (x_ref, w0_ref, b0_ref, w1_ref, b1_ref, ..., o_ref)
    #   x_ref : (bm, Din)      bf16
    #   wi_ref: (K_i, Nout_i_p) bf16 (grid-resident)
    #   bi_ref: (1, Nout_i_p)   f32  (grid-resident)
    #   o_ref : (bm, Nout_last_p) f32
    x_ref = refs[0]
    o_ref = refs[-1]
    wb = refs[1:-1]

    h = x_ref[...]  # bf16 activation, vreg/VMEM resident between layers
    for i in range(n_layers):
        w = wb[2 * i][...]
        b = wb[2 * i + 1][...]
        # bf16 operands -> MXU, f32 accumulation; bias-add in f32.
        y = jnp.dot(h, w, preferred_element_type=jnp.float32) + b
        if i < n_layers - 1:
            # ReLU in f32 (VALU-safe on v5e), carry activation as bf16 so the
            # next matmul consumes MXU-native operands directly.
            h = jnp.maximum(y, 0.0).astype(jnp.bfloat16)
        else:
            o_ref[...] = y.astype(o_ref.dtype)


def _vmem_budget_bytes(params, bm, d_in, d_out_p, weight_buffers):
    w_bytes = sum(int(w.size) * w.dtype.itemsize + int(b.size) * b.dtype.itemsize
                  for w, b in params)
    io_bytes = 2 * (bm * d_in * 2) + 2 * (bm * d_out_p * 4)  # double-buffered x / out tiles
    act_bytes = 2 * bm * max(int(w.shape[1]) for w, _ in params) * 4  # live acc headroom
    return weight_buffers * w_bytes + io_bytes + act_bytes


def fnn_forward(x, params, *, out_dim, bm=None):
    """x: (B, input_dim) f32.  params: list of (W bf16 (K, out_p), b f32 (1, out_p)).
    Returns (B, out_dim) f32."""
    B, Din = x.shape
    n_layers = len(params)
    Dout_p = int(params[-1][0].shape[1])

    if bm is None:
        bm = _auto_bm(B)
    bm = max(8, _round_up(bm, 8))
    Bp = _round_up(B, bm)

    # Only wrapper-side rewrite of x is the bf16 cast; pad batch rows only if
    # B is not a tile multiple (padded rows just see bias -> finite values
    # that are sliced off below).
    if Bp == B:
        xb = x.astype(jnp.bfloat16)
    else:
        xb = jnp.zeros((Bp, Din), jnp.bfloat16).at[:B].set(x.astype(jnp.bfloat16))

    grid = (Bp // bm,)

    flat_args = [xb]
    for w, b in params:
        flat_args.append(w)
        flat_args.append(b)

    flops = 2 * Bp * sum(int(w.shape[0]) * int(w.shape[1]) for w, _ in params)
    bytes_accessed = (int(xb.size) * 2
                      + sum(int(w.size) * 2 + int(b.size) * 4 for w, b in params)
                      + Bp * Dout_p * 4)

    def build_and_call(single_buffer_weights):
        def resident_spec(shape):
            # Constant index_map -> weights/biases stay VMEM-resident across
            # batch tiles (no re-DMA).  Single-buffer them so they don't
            # reserve 2x VMEM.
            if single_buffer_weights:
                return pl.BlockSpec(shape, lambda i: (0, 0),
                                    pipeline_mode=pl.Buffered(1))
            return pl.BlockSpec(shape, lambda i: (0, 0))

        in_specs = [pl.BlockSpec((bm, Din), lambda i: (i, 0))]
        for w, b in params:
            in_specs.append(resident_spec(w.shape))
            in_specs.append(resident_spec(b.shape))

        weight_buffers = 1 if single_buffer_weights else 2
        needed = _vmem_budget_bytes(params, bm, Din, Dout_p, weight_buffers)
        # TODO(synk): if resident weights alone exceed ~40 MiB (v7x has only
        # 64 MiB VMEM), tile each layer's output-feature dim (or split layers
        # across pallas_calls) instead of keeping every layer fully resident.
        vmem_limit = int(min(max(needed + (8 << 20), 32 << 20), 100 << 20))

        return pl.pallas_call(
            functools.partial(_fused_mlp_kernel, n_layers=n_layers),
            out_shape=jax.ShapeDtypeStruct((Bp, Dout_p), jnp.float32),
            grid=grid,
            in_specs=in_specs,
            out_specs=pl.BlockSpec((bm, Dout_p), lambda i: (i, 0)),
            compiler_params=pltpu.CompilerParams(
                dimension_semantics=("parallel",),
                vmem_limit_bytes=vmem_limit),
            cost_estimate=pl.CostEstimate(
                flops=flops, transcendentals=0, bytes_accessed=bytes_accessed),
        )(*flat_args)

    try:
        out = build_and_call(True)
    except Exception:
        # pl.Buffered(1) (single-buffered resident weights) not supported by
        # this jax/Mosaic build -> default double buffering (still correct).
        out = build_and_call(False)

    return out[:B, :out_dim]


class FNNPallas:
    """Mirror of the PyTorch FNN module (Linear->ReLU ... ->Linear(2))."""

    OUT_DIM = 2

    def __init__(self, input_dim, hidden_dims, *, key):
        dims_in = [input_dim] + list(hidden_dims)
        dims_out = list(hidden_dims) + [self.OUT_DIM]
        self.input_dim = input_dim

        self.params = []       # (W bf16 (K, out_p), b f32 (1, out_p)) for the kernel
        self._ref_params = []  # true f32 (d_in, d_out), (d_out,) for the reference
        prev_out_p = None
        for li, (d_in, d_out) in enumerate(zip(dims_in, dims_out)):
            key, kw, kb = jax.random.split(key, 3)
            bound = 1.0 / np.sqrt(d_in)  # PyTorch nn.Linear default init
            w = jax.random.uniform(kw, (d_out, d_in), jnp.float32, -bound, bound)
            b = jax.random.uniform(kb, (d_out,), jnp.float32, -bound, bound)
            self._ref_params.append((jnp.transpose(w), b))

            out_p = _round_up(d_out, 128)  # lane-dense (128-wide) outputs
            # Layer 0 keeps an unpadded contraction dim (input is read
            # unpadded); deeper layers consume the 128-padded activations of
            # the previous layer.
            k_dim = d_in if li == 0 else prev_out_p
            w_pad = (jnp.zeros((k_dim, out_p), jnp.float32)
                     .at[:d_in, :d_out].set(jnp.transpose(w))
                     .astype(jnp.bfloat16))
            b_pad = jnp.zeros((1, out_p), jnp.float32).at[0, :d_out].set(b)
            self.params.append((w_pad, b_pad))
            prev_out_p = out_p

    def __call__(self, x, *, bm=None):
        return fnn_forward(x, self.params, out_dim=self.OUT_DIM, bm=bm)

    def reference(self, x):
        # Pure-JAX f32 reference with the true (un-quantized) weights.
        h = x
        n = len(self._ref_params)
        for i, (w, b) in enumerate(self._ref_params):
            h = h @ w + b
            if i < n - 1:
                h = jnp.maximum(h, 0.0)
        return h


if __name__ == "__main__":
    key = jax.random.PRNGKey(0)
    k_x, k_params = jax.random.split(key)

    batch = 256          # auto-tiling -> bm=128, grid=(2,) "parallel" tiles
    input_dim = 32
    hidden_dims = (64, 32)

    x = jax.random.normal(k_x, (batch, input_dim), dtype=jnp.float32)

    model = FNNPallas(input_dim, hidden_dims, key=k_params)
    out = jax.block_until_ready(model(x))

    assert out.shape == (batch, 2)
    assert out.dtype == jnp.float32
    assert bool(jnp.all(jnp.isfinite(out)))

    # Reference uses the true f32 weights; loose tolerance covers bf16
    # weight/activation storage in the kernel (MXU accumulates in f32).
    ref = model.reference(x)
    np.testing.assert_allclose(np.asarray(out), np.asarray(ref),
                               rtol=1e-1, atol=1e-1)

    print("KERNEL_OK")
</pallas_src>

<mosaic_0001>
module attributes {stable_mosaic.version = 11 : i64} {
  func.func @_fused_mlp_kernel(%arg0: i32, %arg1: memref<128x32xbf16, #tpu.memory_space<vmem>>, %arg2: memref<32x128xbf16, #tpu.memory_space<vmem>>, %arg3: memref<1x128xf32, #tpu.memory_space<vmem>>, %arg4: memref<128x128xbf16, #tpu.memory_space<vmem>>, %arg5: memref<1x128xf32, #tpu.memory_space<vmem>>, %arg6: memref<128x128xbf16, #tpu.memory_space<vmem>>, %arg7: memref<1x128xf32, #tpu.memory_space<vmem>>, %arg8: memref<128x128xf32, #tpu.memory_space<vmem>>) attributes {dimension_semantics = [#tpu.dimension_semantics<parallel>], iteration_bounds = array<i64: 2>, scalar_prefetch = 0 : i64, scratch_operands = 0 : i64, tpu.core_type = #tpu.core_type<tc>, window_params = [{transform_indices = @transform_0, window_bounds = array<i64: 128, 32>}, {pipeline_mode = #tpu.pipeline_mode<synchronous>, transform_indices = @transform_1, window_bounds = array<i64: 32, 128>}, {pipeline_mode = #tpu.pipeline_mode<synchronous>, transform_indices = @transform_2, window_bounds = array<i64: 1, 128>}, {pipeline_mode = #tpu.pipeline_mode<synchronous>, transform_indices = @transform_3, window_bounds = array<i64: 128, 128>}, {pipeline_mode = #tpu.pipeline_mode<synchronous>, transform_indices = @transform_4, window_bounds = array<i64: 1, 128>}, {pipeline_mode = #tpu.pipeline_mode<synchronous>, transform_indices = @transform_5, window_bounds = array<i64: 128, 128>}, {pipeline_mode = #tpu.pipeline_mode<synchronous>, transform_indices = @transform_6, window_bounds = array<i64: 1, 128>}, {transform_indices = @transform_7, window_bounds = array<i64: 128, 128>}]} {
    %c0 = arith.constant 0 : index
    %c0_0 = arith.constant 0 : index
    %0 = vector.load %arg1[%c0, %c0_0] : memref<128x32xbf16, #tpu.memory_space<vmem>>, vector<128x32xbf16>
    %c0_1 = arith.constant 0 : index
    %c0_2 = arith.constant 0 : index
    %1 = vector.load %arg2[%c0_1, %c0_2] : memref<32x128xbf16, #tpu.memory_space<vmem>>, vector<32x128xbf16>
    %c0_3 = arith.constant 0 : index
    %c0_4 = arith.constant 0 : index
    %2 = vector.load %arg3[%c0_3, %c0_4] : memref<1x128xf32, #tpu.memory_space<vmem>>, vector<1x128xf32>
    %cst = arith.constant dense<0.000000e+00> : vector<128x128xf32>
    %3 = tpu.matmul %0, %1, %cst {dimension_numbers = #tpu.dot_dimension_numbers<[1], [0], [0], [1], [0, 0, 1, 1], [], []>} : vector<128x32xbf16>, vector<32x128xbf16>, vector<128x128xf32> -> vector<128x128xf32>
    %4 = vector.broadcast %2 : vector<1x128xf32> to vector<128x128xf32>
    %5 = arith.addf %3, %4 : vector<128x128xf32>
    %cst_5 = arith.constant 0.000000e+00 : f32
    %6 = vector.broadcast %cst_5 : f32 to vector<128x128xf32>
    %7 = arith.maximumf %5, %6 : vector<128x128xf32>
    %8 = arith.truncf %7 : vector<128x128xf32> to vector<128x128xbf16>
    %c0_6 = arith.constant 0 : index
    %c0_7 = arith.constant 0 : index
    %9 = vector.load %arg4[%c0_6, %c0_7] : memref<128x128xbf16, #tpu.memory_space<vmem>>, vector<128x128xbf16>
    %c0_8 = arith.constant 0 : index
    %c0_9 = arith.constant 0 : index
    %10 = vector.load %arg5[%c0_8, %c0_9] : memref<1x128xf32, #tpu.memory_space<vmem>>, vector<1x128xf32>
    %cst_10 = arith.constant dense<0.000000e+00> : vector<128x128xf32>
    %11 = tpu.matmul %8, %9, %cst_10 {dimension_numbers = #tpu.dot_dimension_numbers<[1], [0], [0], [1], [0, 0, 1, 1], [], []>} : vector<128x128xbf16>, vector<128x128xbf16>, vector<128x128xf32> -> vector<128x128xf32>
    %12 = vector.broadcast %10 : vector<1x128xf32> to vector<128x128xf32>
    %13 = arith.addf %11, %12 : vector<128x128xf32>
    %cst_11 = arith.constant 0.000000e+00 : f32
    %14 = vector.broadcast %cst_11 : f32 to vector<128x128xf32>
    %15 = arith.maximumf %13, %14 : vector<128x128xf32>
    %16 = arith.truncf %15 : vector<128x128xf32> to vector<128x128xbf16>
    %c0_12 = arith.constant 0 : index
    %c0_13 = arith.constant 0 : index
    %17 = vector.load %arg6[%c0_12, %c0_13] : memref<128x128xbf16, #tpu.memory_space<vmem>>, vector<128x128xbf16>
    %c0_14 = arith.constant 0 : index
    %c0_15 = arith.constant 0 : index
    %18 = vector.load %arg7[%c0_14, %c0_15] : memref<1x128xf32, #tpu.memory_space<vmem>>, vector<1x128xf32>
    %cst_16 = arith.constant dense<0.000000e+00> : vector<128x128xf32>
    %19 = tpu.matmul %16, %17, %cst_16 {dimension_numbers = #tpu.dot_dimension_numbers<[1], [0], [0], [1], [0, 0, 1, 1], [], []>} : vector<128x128xbf16>, vector<128x128xbf16>, vector<128x128xf32> -> vector<128x128xf32>
    %20 = vector.broadcast %18 : vector<1x128xf32> to vector<128x128xf32>
    %21 = arith.addf %19, %20 : vector<128x128xf32>
    %c0_17 = arith.constant 0 : index
    %c0_18 = arith.constant 0 : index
    %22 = vector.load %arg8[%c0_17, %c0_18] : memref<128x128xf32, #tpu.memory_space<vmem>>, vector<128x128xf32>
    tpu.vector_store %arg8[%c0_17, %c0_18], %21 {strides = array<i32>} : memref<128x128xf32, #tpu.memory_space<vmem>>, vector<128x128xf32>,
    return
  }
  func.func @transform_0(%arg0: i32) -> (i32, i32) {
    %c0_i32 = arith.constant 0 : i32
    %c0_i32_0 = arith.constant 0 : i32
    return %arg0, %c0_i32 : i32, i32
  }
  func.func @transform_1(%arg0: i32) -> (i32, i32) {
    %c0_i32 = arith.constant 0 : i32
    %c0_i32_0 = arith.constant 0 : i32
    %c0_i32_1 = arith.constant 0 : i32
    return %c0_i32, %c0_i32_0 : i32, i32
  }
  func.func @transform_2(%arg0: i32) -> (i32, i32) {
    %c0_i32 = arith.constant 0 : i32
    %c0_i32_0 = arith.constant 0 : i32
    %c0_i32_1 = arith.constant 0 : i32
    return %c0_i32, %c0_i32_0 : i32, i32
  }
  func.func @transform_3(%arg0: i32) -> (i32, i32) {
    %c0_i32 = arith.constant 0 : i32
    %c0_i32_0 = arith.constant 0 : i32
    %c0_i32_1 = arith.constant 0 : i32
    return %c0_i32, %c0_i32_0 : i32, i32
  }
  func.func @transform_4(%arg0: i32) -> (i32, i32) {
    %c0_i32 = arith.constant 0 : i32
    %c0_i32_0 = arith.constant 0 : i32
    %c0_i32_1 = arith.constant 0 : i32
    return %c0_i32, %c0_i32_0 : i32, i32
  }
  func.func @transform_5(%arg0: i32) -> (i32, i32) {
    %c0_i32 = arith.constant 0 : i32
    %c0_i32_0 = arith.constant 0 : i32
    %c0_i32_1 = arith.constant 0 : i32
    return %c0_i32, %c0_i32_0 : i32, i32
  }
  func.func @transform_6(%arg0: i32) -> (i32, i32) {
    %c0_i32 = arith.constant 0 : i32
    %c0_i32_0 = arith.constant 0 : i32
    %c0_i32_1 = arith.constant 0 : i32
    return %c0_i32, %c0_i32_0 : i32, i32
  }
  func.func @transform_7(%arg0: i32) -> (i32, i32) {
    %c0_i32 = arith.constant 0 : i32
    %c0_i32_0 = arith.constant 0 : i32
    return %arg0, %c0_i32 : i32, i32
  }
}

module attributes {stable_mosaic.version = 11 : i64} {
  func.func @_fused_mlp_kernel(%arg0: i32, %arg1: memref<128x32xbf16, #tpu.memory_space<vmem>>, %arg2: memref<32x128xbf16, #tpu.memory_space<vmem>>, %arg3: memref<1x128xf32, #tpu.memory_space<vmem>>, %arg4: memref<128x128xbf16, #tpu.memory_space<vmem>>, %arg5: memref<1x128xf32, #tpu.memory_space<vmem>>, %arg6: memref<128x128xbf16, #tpu.memory_space<vmem>>, %arg7: memref<1x128xf32, #tpu.memory_space<vmem>>, %arg8: memref<128x128xf32, #tpu.memory_space<vmem>>) attributes {dimension_semantics = [#tpu.dimension_semantics<parallel>], iteration_bounds = array<i64: 2>, scalar_prefetch = 0 : i64, scratch_operands = 0 : i64, tpu.core_type = #tpu.core_type<tc>, window_params = [{transform_indices = @transform_0, window_bounds = array<i64: 128, 32>}, {pipeline_mode = #tpu.pipeline_mode<synchronous>, transform_indices = @transform_1, window_bounds = array<i64: 32, 128>}, {pipeline_mode = #tpu.pipeline_mode<synchronous>, transform_indices = @transform_2, window_bounds = array<i64: 1, 128>}, {pipeline_mode = #tpu.pipeline_mode<synchronous>, transform_indices = @transform_3, window_bounds = array<i64: 128, 128>}, {pipeline_mode = #tpu.pipeline_mode<synchronous>, transform_indices = @transform_4, window_bounds = array<i64: 1, 128>}, {pipeline_mode = #tpu.pipeline_mode<synchronous>, transform_indices = @transform_5, window_bounds = array<i64: 128, 128>}, {pipeline_mode = #tpu.pipeline_mode<synchronous>, transform_indices = @transform_6, window_bounds = array<i64: 1, 128>}, {transform_indices = @transform_7, window_bounds = array<i64: 128, 128>}]} {
    %c0 = arith.constant 0 : index
    %c0_0 = arith.constant 0 : index
    %0 = vector.load %arg1[%c0, %c0_0] : memref<128x32xbf16, #tpu.memory_space<vmem>>, vector<128x32xbf16>
    %c0_1 = arith.constant 0 : index
    %c0_2 = arith.constant 0 : index
    %1 = vector.load %arg2[%c0_1, %c0_2] : memref<32x128xbf16, #tpu.memory_space<vmem>>, vector<32x128xbf16>
    %c0_3 = arith.constant 0 : index
    %c0_4 = arith.constant 0 : index
    %2 = vector.load %arg3[%c0_3, %c0_4] : memref<1x128xf32, #tpu.memory_space<vmem>>, vector<1x128xf32>
    %cst = arith.constant dense<0.000000e+00> : vector<128x128xf32>
    %3 = tpu.matmul %0, %1, %cst {dimension_numbers = #tpu.dot_dimension_numbers<[1], [0], [0], [1], [0, 0, 1, 1], [], []>} : vector<128x32xbf16>, vector<32x128xbf16>, vector<128x128xf32> -> vector<128x128xf32>
    %4 = vector.broadcast %2 : vector<1x128xf32> to vector<128x128xf32>
    %5 = arith.addf %3, %4 : vector<128x128xf32>
    %cst_5 = arith.constant 0.000000e+00 : f32
    %6 = vector.broadcast %cst_5 : f32 to vector<128x128xf32>
    %7 = arith.maximumf %5, %6 : vector<128x128xf32>
    %8 = arith.truncf %7 : vector<128x128xf32> to vector<128x128xbf16>
    %c0_6 = arith.constant 0 : index
    %c0_7 = arith.constant 0 : index
    %9 = vector.load %arg4[%c0_6, %c0_7] : memref<128x128xbf16, #tpu.memory_space<vmem>>, vector<128x128xbf16>
    %c0_8 = arith.constant 0 : index
    %c0_9 = arith.constant 0 : index
    %10 = vector.load %arg5[%c0_8, %c0_9] : memref<1x128xf32, #tpu.memory_space<vmem>>, vector<1x128xf32>
    %cst_10 = arith.constant dense<0.000000e+00> : vector<128x128xf32>
    %11 = tpu.matmul %8, %9, %cst_10 {dimension_numbers = #tpu.dot_dimension_numbers<[1], [0], [0], [1], [0, 0, 1, 1], [], []>} : vector<128x128xbf16>, vector<128x128xbf16>, vector<128x128xf32> -> vector<128x128xf32>
    %12 = vector.broadcast %10 : vector<1x128xf32> to vector<128x128xf32>
    %13 = arith.addf %11, %12 : vector<128x128xf32>
    %cst_11 = arith.constant 0.000000e+00 : f32
    %14 = vector.broadcast %cst_11 : f32 to vector<128x128xf32>
    %15 = arith.maximumf %13, %14 : vector<128x128xf32>
    %16 = arith.truncf %15 : vector<128x128xf32> to vector<128x128xbf16>
    %c0_12 = arith.constant 0 : index
    %c0_13 = arith.constant 0 : index
    %17 = vector.load %arg6[%c0_12, %c0_13] : memref<128x128xbf16, #tpu.memory_space<vmem>>, vector<128x128xbf16>
    %c0_14 = arith.constant 0 : index
    %c0_15 = arith.constant 0 : index
    %18 = vector.load %arg7[%c0_14, %c0_15] : memref<1x128xf32, #tpu.memory_space<vmem>>, vector<1x128xf32>
    %cst_16 = arith.constant dense<0.000000e+00> : vector<128x128xf32>
    %19 = tpu.matmul %16, %17, %cst_16 {dimension_numbers = #tpu.dot_dimension_numbers<[1], [0], [0], [1], [0, 0, 1, 1], [], []>} : vector<128x128xbf16>, vector<128x128xbf16>, vector<128x128xf32> -> vector<128x128xf32>
    %20 = vector.broadcast %18 : vector<1x128xf32> to vector<128x128xf32>
    %21 = arith.addf %19, %20 : vector<128x128xf32>
    %c0_17 = arith.constant 0 : index
    %c0_18 = arith.constant 0 : index
    %22 = vector.load %arg8[%c0_17, %c0_18] : memref<128x128xf32, #tpu.memory_space<vmem>>, vector<128x128xf32>
    tpu.vector_store %arg8[%c0_17, %c0_18], %21 {strides = array<i32>} : memref<128x128xf32, #tpu.memory_space<vmem>>, vector<128x128xf32>,
    return
  }
  func.func @transform_0(%arg0: i32) -> (i32, i32) {
    %c0_i32 = arith.constant 0 : i32
    %c0_i32_0 = arith.constant 0 : i32
    return %arg0, %c0_i32 : i32, i32
  }
  func.func @transform_1(%arg0: i32) -> (i32, i32) {
    %c0_i32 = arith.constant 0 : i32
    %c0_i32_0 = arith.constant 0 : i32
    %c0_i32_1 = arith.constant 0 : i32
    return %c0_i32, %c0_i32_0 : i32, i32
  }
  func.func @transform_2(%arg0: i32) -> (i32, i32) {
    %c0_i32 = arith.constant 0 : i32
    %c0_i32_0 = arith.constant 0 : i32
    %c0_i32_1 = arith.constant 0 : i32
    return %c0_i32, %c0_i32_0 : i32, i32
  }
  func.func @transform_3(%arg0: i32) -> (i32, i32) {
    %c0_i32 = arith.constant 0 : i32
    %c0_i32_0 = arith.constant 0 : i32
    %c0_i32_1 = arith.constant 0 : i32
    return %c0_i32, %c0_i32_0 : i32, i32
  }
  func.func @transform_4(%arg0: i32) -> (i32, i32) {
    %c0_i32 = arith.constant 0 : i32
    %c0_i32_0 = arith.constant 0 : i32
    %c0_i32_1 = arith.constant 0 : i32
    return %c0_i32, %c0_i32_0 : i32, i32
  }
  func.func @transform_5(%arg0: i32) -> (i32, i32) {
    %c0_i32 = arith.constant 0 : i32
    %c0_i32_0 = arith.constant 0 : i32
    %c0_i32_1 = arith.constant 0 : i32
    return %c0_i32, %c0_i32_0 : i32, i32
  }
  func.func @transform_6(%arg0: i32) -> (i32, i32) {
    %c0_i32 = arith.constant 0 : i32
    %c0_i32_0 = arith.constant 0 : i32
    %c0_i32_1 = arith.constant 0 : i32
    return %c0_i32, %c0_i32_0 : i32, i32
  }
  func.func @transform_7(%arg0: i32) -> (i32, i32) {
    %c0_i32 = arith.constant 0 : i32
    %c0_i32_0 = arith.constant 0 : i32
    return %arg0, %c0_i32 : i32, i32
  }
}

</mosaic_0001>

<bundles_post_ra>
// kernel: tpu_custom_call.1
= control target key start
LH: loop header
LB: loop body
LE: loop exit
PB: predicated region body
PF: predicated region fallthrough
CT: control target
= control target key end

     0   :  { %12 = vsyncpa [#allocation3], 0  ;;  %s1514_s0 = inlined_call_operand.vmem [shape: bf16[256,32], index: 0, kind: input, shape index: {}]   ;;  %s1515_s1 = inlined_call_operand.vmem [shape: bf16[32,128], index: 1, kind: input, shape index: {}]   ;;  %s1516_s2 = inlined_call_operand.vmem [shape: f32[1,128], index: 2, kind: input, shape index: {}]   ;;  %s1517_s3 = inlined_call_operand.vmem [shape: bf16[128,128], index: 3, kind: input, shape index: {}]   ;;  %s1518_s4 = inlined_call_operand.vmem [shape: f32[1,128], index: 4, kind: input, shape index: {}]   ;;  %s1519_s5 = inlined_call_operand.vmem [shape: bf16[128,128], index: 5, kind: input, shape index: {}]   ;;  %s1520_s6 = inlined_call_operand.vmem [shape: f32[1,128], index: 6, kind: input, shape index: {}]   ;;  %s1521_s7 = inlined_call_operand.hbm [shape: f32[256,128], index: 7, kind: output, shape index: {}]  }
   0x1   :  { %14 = vsyncpa [#allocation3 + $0x1], 0  ;;  %s1308_s24 = smov 0   ;;  %s1310_s25 = smov 0  }
   0x2   :  { %s1312_s26 = smov 0   ;;  %s1314_s27 = smov 0  }
   0x3 LB: > { %s1329_s28 = sadd.s32 4294967295, %s1263_s27   ;;  %s958_s29 = sadd.s32 4294967294, %s1263_s27   ;;  %s1263_s27 = sphi %s1314_s27, %s1527_s27   ;;  %s1259_s26 = sphi %s1312_s26, %s1526_s26   ;;  %s1255_s25 = sphi %s1310_s25, %s1525_s25   ;;  %s1251_s24 = sphi %s1308_s24, %s1524_s24  }
   0x4   : > { %s1333_s30 = sadd.s32 1, %s1263_s27   ;;  %s179_s8 = sadd.s32 1, %s1259_s26 }
   0x5   : > { %s176_s9 = ssub.s32 %s1263_s27, %s1333_s30  ;;  %p189_p0 = scmp.ne.s32.totalorder %s1259_s26, %s1255_s25 }
   0x6   : > { %p177_p1 = scmp.eq.s32.totalorder %s176_s9, 0  ;;  %p190_p2 = scmp.eq.s32.totalorder %s1329_s28, 1 }
   0x7   : > { %p195_p3 = scmp.ne.s32.totalorder %s1255_s25, %s1251_s24  ;;  %p196_p4 = scmp.eq.s32.totalorder %s958_s29, 1 }
   0x8   : > { %s1344_s10 = scalar_select %p177_p1, %s1259_s26, %s179_s8  }
   0x9   : > { %p1346_p5 = por %p190_p2, %p189_p0  ;;  %p1350_p6 = por %p196_p4, %p195_p3 }
   0xa   : > { %p961_p7 = scmp.ge.s32.totalorder %s1263_s27, 1  ;;  %p241_p8 = scmp.lt.s32.totalorder %s1263_s27, 3 }
   0xc   : > { %p242_p9 = pnand %p961_p7, %p241_p8 }
   0xd   : > { %v1175_v0 = vld [vmem:[%s1515_s1] sm:$0xff] (!%p242_p9)   ;;  %s963_s15 = sshll.u32 (!%p242_p9), %s1329_s28, 4  ;;  %v1176_v1 = vld [vmem:[%s1515_s1 + $0x8] sm:$0xff] (!%p242_p9)   ;;  %vm360_vm0 = vcmask (!%p242_p9), 261120   ;;  %v1187_v4 = vld [vmem:[%s1517_s3 + $0x10] sm:$0xff] (!%p242_p9)   ;;  %s270_s16 = sand.u32 (!%p242_p9), 1, %s1255_s25  }
   0xe   : > { %245 = sbr.rel (%p242_p9) target bundleno = 726 (0x2d6), region = 48  ;;  %p274_p10 = scmp.lt.s32.totalorder (!%p242_p9), %s963_s15, 31  ;;  %1050 = vmatprep.subr.bf16.mxu0 (!%p242_p9), %v1175_v0  ;;  %v1185_v2 = vld [vmem:[%s1517_s3] sm:$0xff] (!%p242_p9)   ;;  %v1186_v3 = vld [vmem:[%s1517_s3 + $0x8] sm:$0xff] (!%p242_p9)   ;;  %v1188_v8 = vld [vmem:[%s1517_s3 + $0x18] sm:$0xff] (!%p242_p9)  }
   0xf   : > { %1051 = vmatpush3.bf16.msra.mxu0 (!%p242_p9), %v1175_v0  ;;  %1070 = vmatprep.subr.bf16.mxu1 (!%p242_p9), %v1185_v2  ;;  %v1189_v9 = vld [vmem:[%s1517_s3 + $0x20] sm:$0xff] (!%p242_p9)   ;;  %v1190_v12 = vld [vmem:[%s1517_s3 + $0x28] sm:$0xff] (!%p242_p9)   ;;  %v1191_v16 = vld [vmem:[%s1517_s3 + $0x30] sm:$0xff] (!%p242_p9)   ;;  %s962_s17 = sshll.u32 (!%p242_p9), %s270_s16, 7  ;;  %s1007_s21 = sshll.u32 (!%p242_p9), %s1329_s28, 11 }
  0x10   : > { %1052 = vmatprep.subr.bf16.mxu0 (!%p242_p9), %v1176_v1  ;;  %1071 = vmatpush3.bf16.msra.mxu1 (!%p242_p9), %v1185_v2  ;;  %v1192_v17 = vld [vmem:[%s1517_s3 + $0x38] sm:$0xff] (!%p242_p9)   ;;  %v1193_v18 = vld [vmem:[%s1519_s5] sm:$0xff] (!%p242_p9)   ;;  %v1194_v19 = vld [vmem:[%s1519_s5 + $0x8] sm:$0xff] (!%p242_p9)   ;;  %s1444_s20 = scalar_lea.vmem (!%p242_p9), [#allocation2], %s962_s17  ;;  %s1464_s9 = scalar_lea.hbm (!%p242_p9), %s1521_s7, %s1007_s21 }
  0x11   : > { %1072 = vmatprep.subr.bf16.mxu1 (!%p242_p9), %v1186_v3  ;;  %v1195_v20 = vld [vmem:[%s1519_s5 + $0x10] sm:$0xff] (!%p242_p9)   ;;  %v1196_v21 = vld [vmem:[%s1519_s5 + $0x18] sm:$0xff] (!%p242_p9)   ;;  %v1197_v22 = vld [vmem:[%s1519_s5 + $0x20] sm:$0xff] (!%p242_p9)   ;;  %s1473_s28 = scalar_lea.sflag (!%p242_p9), [#allocation3], %s270_s16 }
  0x12   : > { %v1198_v23 = vld [vmem:[%s1519_s5 + $0x28] sm:$0xff] (!%p242_p9)   ;;  %v965_v24 = vld [vmem:[%s1516_s2] ss:$0 sm:$0xff] (!%p242_p9) }
  0x13   : > { %1053 = vmatpush3.bf16.msra.mxu0 (!%p242_p9), %v1176_v1 }
  0x14   : > { %1073 = vmatpush3.bf16.msra.mxu1 (!%p242_p9), %v1186_v3  ;;  %1102 = vmatprep.subr.bf16.mxu0 (!%p242_p9), %v1193_v18 }
  0x15   : > { %s1529_s15 = smov (!%p274_p10, %s963_s15), 31  ;;  %1074 = vmatprep.subr.bf16.mxu1 %v1187_v4 }
  0x16   : > { %s964_s22 = sshll.u32 %s1529_s15, 2 }
  0x17   : > { %s1372_s8 = scalar_lea.vmem %s1514_s0, %s964_s22  ;;  %s896_s22 = sshll.u32 %s1444_s20, 4  ;;  %s1466_s22 = int_to_ptr.vmem [resolvable:$true] %s896_s22 }
  0x18   : > { %v1177_v5 = vld [vmem:[%s1372_s8] sm:$0xff]   ;;  %v1178_v6 = vld [vmem:[%s1372_s8 + $0x8] sm:$0xff]   ;;  %v1179_v7 = vld [vmem:[%s1372_s8 + $0x10] sm:$0xff]   ;;  %1075 = vmatpush3.bf16.msra.mxu1 %v1187_v4  ;;  %s1201_s13 = scalar_lea.vmem %s1466_s22, 2048 }
  0x19   : > { %1054 = vmatprep.mubr.msk.bf16.mxu0 %vm360_vm0, %v1177_v5  ;;  %v1180_v10 = vld [vmem:[%s1372_s8 + $0x18] sm:$0xff]   ;;  %1076 = vmatprep.subr.bf16.mxu1 %v1188_v8  ;;  %v1181_v11 = vld [vmem:[%s1372_s8 + $0x20] sm:$0xff]   ;;  %v1182_v13 = vld [vmem:[%s1372_s8 + $0x28] sm:$0xff]   ;;  %p1202_p11 = scmp.ne.s32.totalorder %s1466_s22, %s1201_s13 }
  0x1a   : > { %1055 = vmatmul.mubr.msk.bf16.vlgmr.msra.gmra.mrb[0].mxu0 %vm360_vm0, %v1178_v6  ;;  %v1183_v14 = vld [vmem:[%s1372_s8 + $0x30] sm:$0xff]   ;;  %v1184_v15 = vld [vmem:[%s1372_s8 + $0x38] sm:$0xff]   ;;  %s1265_s8 = smov [#allocation2]  }
  0x1b   : > { %1058 = vmatprep.mubr.msk.bf16.mxu0 %vm360_vm0, %v1179_v7  ;;  %1103 = vmatpush3.bf16.msra.mxu0 %v1193_v18  ;;  %v1200_v18 = vld [vmem:[%s1519_s5 + $0x38] sm:$0xff]   ;;  %p1203_p12 = pnand %p1202_p11, %p1346_p5  ;;  %s1205_s14 = sshll.u32 %s1265_s8, 4  ;;  %s1206_s14 = int_to_ptr.vmem [resolvable:$false] %s1205_s14 }
  0x1c   : > { %1077 = vmatpush3.bf16.msra.mxu1 %v1188_v8  ;;  %1104 = vmatprep.subr.bf16.mxu0 %v1194_v19  ;;  %s1207_s15 = scalar_lea.vmem %s1206_s14, 4096  ;;  %p1208_p0 = scmp.lt.s32.totalorder %s1466_s22, %s1206_s14 }
  0x1d   : > { %1078 = vmatprep.subr.bf16.mxu1 %v1189_v9  ;;  %p1204_p13 = pneg %p1203_p12  ;;  %p1209_p1 = scmp.lt.s32.totalorder %s1207_s15, %s1201_s13 }
  0x1f   : > { %1105 = vmatpush3.bf16.msra.mxu0 %v1194_v19  ;;  %v984_v19 = vld [vmem:[%s1518_s4] ss:$0 sm:$0xff]  ;;  %p1210_p2 = por %p1209_p1, %p1208_p0 }
  0x20   : > { %1079 = vmatpush3.bf16.msra.mxu1 %v1189_v9  ;;  %1106 = vmatprep.subr.bf16.mxu0 %v1195_v20 }
  0x21   : > { %1080 = vmatprep.subr.bf16.mxu1 %v1190_v12  ;;  %p1211_p3 = pnand %p1210_p2, %p1204_p13 }
  0x22   : > { %1059 = vmatmul.mubr.msk.bf16.gmra.mrb[4].mxu0 %vm360_vm0, %v1180_v10 }
  0x23   : > { %1062 = vmatprep.mubr.msk.bf16.mxu0 %vm360_vm0, %v1181_v11  ;;  %1107 = vmatpush3.bf16.msra.mxu0 %v1195_v20 }
  0x24   : > { %1081 = vmatpush3.bf16.msra.mxu1 %v1190_v12  ;;  %1108 = vmatprep.subr.bf16.mxu0 %v1196_v21 }
  0x25   : > { %1082 = vmatprep.subr.bf16.mxu1 %v1191_v16 }
  0x27   : > { %1109 = vmatpush3.bf16.msra.mxu0 %v1196_v21 }
  0x28   : > { %1083 = vmatpush3.bf16.msra.mxu1 %v1191_v16  ;;  %1110 = vmatprep.subr.bf16.mxu0 %v1197_v22 }
  0x29   : > { %1084 = vmatprep.subr.bf16.mxu1 %v1192_v17 }
  0x2a   : > { %1063 = vmatmul.mubr.msk.bf16.gmra.mrb[8].mxu0 %vm360_vm0, %v1182_v13 }
  0x2b   : > { %1066 = vmatprep.mubr.msk.bf16.mxu0 %vm360_vm0, %v1183_v14  ;;  %1111 = vmatpush3.bf16.msra.mxu0 %v1197_v22 }
  0x2c   : > { %1085 = vmatpush3.bf16.msra.mxu1 %v1192_v17  ;;  %1112 = vmatprep.subr.bf16.mxu0 %v1198_v23  ;;  %v1199_v17 = vld [vmem:[%s1519_s5 + $0x30] sm:$0xff]  }
  0x2f   : > { %1113 = vmatpush3.bf16.msra.mxu0 %v1198_v23 }
  0x30   : > { %1114 = vmatprep.subr.bf16.mxu0 %v1199_v17 }
  0x32   : > { %1067 = vmatmul.mubr.msk.bf16.gmra.mrb[12].mxu0 %vm360_vm0, %v1184_v15 }
  0x33   : > { %1115 = vmatpush3.bf16.msra.mxu0 %v1199_v17 }
  0x34   : > { %1116 = vmatprep.subr.bf16.mxu0 %v1200_v18 }
  0x37   : > { %1117 = vmatpush3.bf16.msra.mxu0 %v1200_v18 }
  0xed   : > { %v1056_v25 = vpop.f32.mrb[0].mxu0 }
  0xee   : > { %v428_v26 = vadd.f32 %v1056_v25, %v965_v24  ;;  %v419_v27 = vpop.f32.mrb[1].mxu0 }
  0xef   : > { %v420_v28 = vadd.f32 %v965_v24, %v419_v27  ;;  %v1057_v29 = vpop.f32.mrb[2].mxu0 }
  0xf0   : > { %v431_v30 = vadd.f32 %v1057_v29, %v965_v24  ;;  %v422_v31 = vpop.f32.mrb[3].mxu0  ;;  %v484_v33 = vmax.f32 %v428_v26, 0.0 }
  0xf1   : > { %v423_v32 = vadd.f32 %v965_v24, %v422_v31  ;;  %v482_v35 = vmax.f32 %v420_v28, 0.0 }
  0xf2   : > { %v485_v34 = vmax.f32 %v431_v30, 0.0 }
  0xf3   : > { %v483_v36 = vmax.f32 %v423_v32, 0.0 }
  0xf4   : > { %v499_v37 = vpack.c.bf16 %v485_v34, %v484_v33 }
  0xf5   : > { %v1060_v38 = vpop.f32.mrb[4].mxu0  ;;  %v498_v39 = vpack.c.bf16 %v483_v36, %v482_v35 }
  0xf6   : > { %v444_v40 = vadd.f32 %v1060_v38, %v965_v24  ;;  %v435_v41 = vpop.f32.mrb[5].mxu0 }
  0xf7   : > { %v436_v42 = vadd.f32 %v965_v24, %v435_v41  ;;  %v1061_v43 = vpop.f32.mrb[6].mxu0  ;;  %1086 = vmatprep.mubr.bf16.mxu1 %v498_v39 }
  0xf8   : > { %v447_v44 = vadd.f32 %v1061_v43, %v965_v24  ;;  %v438_v45 = vpop.f32.mrb[7].mxu0  ;;  %1087 = vmatmul.mubr.bf16.vlgmr.msra.gmra.mrb[0].mxu1 %v499_v37  ;;  %v488_v47 = vmax.f32 %v444_v40, 0.0 }
  0xf9   : > { %v439_v46 = vadd.f32 %v965_v24, %v438_v45  ;;  %v486_v49 = vmax.f32 %v436_v42, 0.0 }
  0xfa   : > { %v489_v48 = vmax.f32 %v447_v44, 0.0 }
  0xfb   : > { %v487_v50 = vmax.f32 %v439_v46, 0.0 }
  0xfc   : > { %v501_v51 = vpack.c.bf16 %v489_v48, %v488_v47 }
  0xfd   : > { %v500_v52 = vpack.c.bf16 %v487_v50, %v486_v49  ;;  %v1064_v53 = vpop.f32.mrb[8].mxu0 }
  0xfe   : > { %v460_v54 = vadd.f32 %v1064_v53, %v965_v24  ;;  %v451_v55 = vpop.f32.mrb[9].mxu0 }
  0xff   : > { %v452_v56 = vadd.f32 %v965_v24, %v451_v55  ;;  %v1065_v57 = vpop.f32.mrb[10].mxu0  ;;  %1090 = vmatprep.mubr.bf16.mxu1 %v500_v52 }
 0x100   : > { %v463_v58 = vadd.f32 %v1065_v57, %v965_v24  ;;  %v454_v59 = vpop.f32.mrb[11].mxu0  ;;  %1091 = vmatmul.mubr.bf16.gmra.mrb[4].mxu1 %v501_v51  ;;  %v492_v61 = vmax.f32 %v460_v54, 0.0 }
 0x101   : > { %v455_v60 = vadd.f32 %v965_v24, %v454_v59  ;;  %v490_v63 = vmax.f32 %v452_v56, 0.0 }
 0x102   : > { %v493_v62 = vmax.f32 %v463_v58, 0.0 }
 0x103   : > { %v491_v0 = vmax.f32 %v455_v60, 0.0 }
 0x104   : > { %v503_v1 = vpack.c.bf16 %v493_v62, %v492_v61 }
 0x105   : > { %v502_v2 = vpack.c.bf16 %v491_v0, %v490_v63  ;;  %v1068_v3 = vpop.f32.mrb[12].mxu0 }
 0x106   : > { %v476_v4 = vadd.f32 %v1068_v3, %v965_v24  ;;  %v467_v5 = vpop.f32.mrb[13].mxu0 }
 0x107   : > { %v468_v6 = vadd.f32 %v965_v24, %v467_v5  ;;  %v1069_v7 = vpop.f32.mrb[14].mxu0  ;;  %1094 = vmatprep.mubr.bf16.mxu1 %v502_v2 }
 0x108   : > { %v479_v8 = vadd.f32 %v1069_v7, %v965_v24  ;;  %v470_v9 = vpop.f32.mrb[15].mxu0  ;;  %1095 = vmatmul.mubr.bf16.gmra.mrb[8].mxu1 %v503_v1  ;;  %v496_v11 = vmax.f32 %v476_v4, 0.0 }
 0x109   : > { %v471_v10 = vadd.f32 %v965_v24, %v470_v9  ;;  %v494_v13 = vmax.f32 %v468_v6, 0.0 }
 0x10a   : > { %v497_v12 = vmax.f32 %v479_v8, 0.0 }
 0x10b   : > { %v495_v14 = vmax.f32 %v471_v10, 0.0 }
 0x10c   : > { %v505_v15 = vpack.c.bf16 %v497_v12, %v496_v11  ;;  %v993_v12 = vld [vmem:[%s1520_s6] ss:$0 sm:$0xff] }
 0x10d   : > { %v504_v16 = vpack.c.bf16 %v495_v14, %v494_v13 }
 0x10f   : > { %1098 = vmatprep.mubr.bf16.mxu1 %v504_v16 }
 0x110   : > { %1099 = vmatmul.mubr.bf16.gmra.mrb[12].mxu1 %v505_v15 }
 0x1cb   : > { %v1088_v20 = vpop.f32.mrb[0].mxu1 }
 0x1cc   : > { %v620_v21 = vadd.f32 %v1088_v20, %v984_v19  ;;  %v611_v22 = vpop.f32.mrb[1].mxu1 }
 0x1cd   : > { %v612_v23 = vadd.f32 %v984_v19, %v611_v22  ;;  %v1089_v24 = vpop.f32.mrb[2].mxu1 }
 0x1ce   : > { %v623_v25 = vadd.f32 %v1089_v24, %v984_v19  ;;  %v614_v26 = vpop.f32.mrb[3].mxu1  ;;  %v676_v28 = vmax.f32 %v620_v21, 0.0 }
 0x1cf   : > { %v615_v27 = vadd.f32 %v984_v19, %v614_v26  ;;  %v674_v30 = vmax.f32 %v612_v23, 0.0 }
 0x1d0   : > { %v677_v29 = vmax.f32 %v623_v25, 0.0 }
 0x1d1   : > { %v675_v31 = vmax.f32 %v615_v27, 0.0 }
 0x1d2   : > { %v691_v32 = vpack.c.bf16 %v677_v29, %v676_v28 }
 0x1d3   : > { %v690_v33 = vpack.c.bf16 %v675_v31, %v674_v30  ;;  %v1092_v34 = vpop.f32.mrb[4].mxu1 }
 0x1d4   : > { %v636_v35 = vadd.f32 %v1092_v34, %v984_v19  ;;  %v627_v36 = vpop.f32.mrb[5].mxu1 }
 0x1d5   : > { %v628_v37 = vadd.f32 %v984_v19, %v627_v36  ;;  %v1093_v38 = vpop.f32.mrb[6].mxu1  ;;  %1118 = vmatprep.mubr.bf16.mxu0 %v690_v33 }
 0x1d6   : > { %v639_v39 = vadd.f32 %v1093_v38, %v984_v19  ;;  %v630_v40 = vpop.f32.mrb[7].mxu1  ;;  %1119 = vmatmul.mubr.bf16.vlgmr.msra.gmra.mrb[16].mxu0 %v691_v32  ;;  %v680_v42 = vmax.f32 %v636_v35, 0.0 }
 0x1d7   : > { %v631_v41 = vadd.f32 %v984_v19, %v630_v40  ;;  %v678_v44 = vmax.f32 %v628_v37, 0.0 }
 0x1d8   : > { %v681_v43 = vmax.f32 %v639_v39, 0.0 }
 0x1d9   : > { %v679_v45 = vmax.f32 %v631_v41, 0.0 }
 0x1da   : > { %v693_v46 = vpack.c.bf16 %v681_v43, %v680_v42 }
 0x1db   : > { %v692_v47 = vpack.c.bf16 %v679_v45, %v678_v44  ;;  %v1096_v48 = vpop.f32.mrb[8].mxu1 }
 0x1dc   : > { %v652_v49 = vadd.f32 %v1096_v48, %v984_v19  ;;  %v643_v50 = vpop.f32.mrb[9].mxu1 }
 0x1dd   : > { %v644_v51 = vadd.f32 %v984_v19, %v643_v50  ;;  %v1097_v52 = vpop.f32.mrb[10].mxu1  ;;  %1122 = vmatprep.mubr.bf16.mxu0 %v692_v47 }
 0x1de   : > { %v655_v53 = vadd.f32 %v1097_v52, %v984_v19  ;;  %v646_v54 = vpop.f32.mrb[11].mxu1  ;;  %1123 = vmatmul.mubr.bf16.gmra.mrb[20].mxu0 %v693_v46  ;;  %v684_v56 = vmax.f32 %v652_v49, 0.0 }
 0x1df   : > { %v647_v55 = vadd.f32 %v984_v19, %v646_v54  ;;  %v682_v58 = vmax.f32 %v644_v51, 0.0 }
 0x1e0   : > { %v685_v57 = vmax.f32 %v655_v53, 0.0 }
 0x1e1   : > { %v683_v59 = vmax.f32 %v647_v55, 0.0 }
 0x1e2   : > { %v695_v60 = vpack.c.bf16 %v685_v57, %v684_v56 }
 0x1e3   : > { %v694_v61 = vpack.c.bf16 %v683_v59, %v682_v58  ;;  %v1100_v62 = vpop.f32.mrb[12].mxu1 }
 0x1e4   : > { %v668_v63 = vadd.f32 %v1100_v62, %v984_v19  ;;  %v659_v0 = vpop.f32.mrb[13].mxu1 }
 0x1e5   : > { %v660_v1 = vadd.f32 %v984_v19, %v659_v0  ;;  %v1101_v2 = vpop.f32.mrb[14].mxu1  ;;  %1126 = vmatprep.mubr.bf16.mxu0 %v694_v61 }
 0x1e6   : > { %v671_v3 = vadd.f32 %v1101_v2, %v984_v19  ;;  %v662_v4 = vpop.f32.mrb[15].mxu1  ;;  %1127 = vmatmul.mubr.bf16.gmra.mrb[24].mxu0 %v695_v60  ;;  %v688_v6 = vmax.f32 %v668_v63, 0.0 }
 0x1e7   : > { %v663_v5 = vadd.f32 %v984_v19, %v662_v4  ;;  %v686_v8 = vmax.f32 %v660_v1, 0.0 }
 0x1e8   : > { %v689_v7 = vmax.f32 %v671_v3, 0.0 }
 0x1e9   : > { %v687_v9 = vmax.f32 %v663_v5, 0.0 }
 0x1ea   : > { %v697_v10 = vpack.c.bf16 %v689_v7, %v688_v6 }
 0x1eb   : > { %v696_v11 = vpack.c.bf16 %v687_v9, %v686_v8 }
 0x1ed   : > { %1130 = vmatprep.mubr.bf16.mxu0 %v696_v11 }
 0x1ee   : > { %1131 = vmatmul.mubr.bf16.gmra.mrb[28].mxu0 %v697_v10 }
 0x2a9   : > { %v1120_v13 = vpop.f32.mrb[16].mxu0 }
 0x2aa   : > { %v812_v14 = vadd.f32 %v1120_v13, %v993_v12  ;;  %v803_v15 = vpop.f32.mrb[17].mxu0 }
 0x2ab   : > { %v804_v16 = vadd.f32 %v993_v12, %v803_v15  ;;  %v1121_v17 = vpop.f32.mrb[18].mxu0 }
 0x2ac   : > { %868 = vst [vmem:[%s1444_s20 + $0x10] sm:$0xff] %v812_v14  ;;  %v815_v18 = vadd.f32 %v1121_v17, %v993_v12  ;;  %v806_v19 = vpop.f32.mrb[19].mxu0 }
 0x2ad   : > { %866 = vst [vmem:[%s1444_s20] sm:$0xff] %v804_v16  ;;  %v807_v20 = vadd.f32 %v993_v12, %v806_v19 }
 0x2ae   : > { %869 = vst [vmem:[%s1444_s20 + $0x18] sm:$0xff] %v815_v18 }
 0x2af   : > { %867 = vst [vmem:[%s1444_s20 + $0x8] sm:$0xff] %v807_v20 }
 0x2b1   : > { %v1124_v21 = vpop.f32.mrb[20].mxu0 }
 0x2b2   : > { %v828_v22 = vadd.f32 %v1124_v21, %v993_v12  ;;  %v819_v23 = vpop.f32.mrb[21].mxu0 }
 0x2b3   : > { %v820_v24 = vadd.f32 %v993_v12, %v819_v23  ;;  %v1125_v25 = vpop.f32.mrb[22].mxu0 }
 0x2b4   : > { %872 = vst [vmem:[%s1444_s20 + $0x30] sm:$0xff] %v828_v22  ;;  %v831_v26 = vadd.f32 %v1125_v25, %v993_v12  ;;  %v822_v27 = vpop.f32.mrb[23].mxu0 }
 0x2b5   : > { %870 = vst [vmem:[%s1444_s20 + $0x20] sm:$0xff] %v820_v24  ;;  %v823_v28 = vadd.f32 %v993_v12, %v822_v27 }
 0x2b6   : > { %873 = vst [vmem:[%s1444_s20 + $0x38] sm:$0xff] %v831_v26 }
 0x2b7   : > { %871 = vst [vmem:[%s1444_s20 + $0x28] sm:$0xff] %v823_v28 }
 0x2b9   : > { %v1128_v29 = vpop.f32.mrb[24].mxu0 }
 0x2ba   : > { %v844_v30 = vadd.f32 %v1128_v29, %v993_v12  ;;  %v835_v31 = vpop.f32.mrb[25].mxu0 }
 0x2bb   : > { %v836_v32 = vadd.f32 %v993_v12, %v835_v31  ;;  %v1129_v33 = vpop.f32.mrb[26].mxu0 }
 0x2bc   : > { %876 = vst [vmem:[%s1444_s20 + $0x50] sm:$0xff] %v844_v30  ;;  %v847_v34 = vadd.f32 %v1129_v33, %v993_v12  ;;  %v838_v35 = vpop.f32.mrb[27].mxu0 }
 0x2bd   : > { %874 = vst [vmem:[%s1444_s20 + $0x40] sm:$0xff] %v836_v32  ;;  %v839_v36 = vadd.f32 %v993_v12, %v838_v35 }
 0x2be   : > { %877 = vst [vmem:[%s1444_s20 + $0x58] sm:$0xff] %v847_v34 }
 0x2bf   : > { %875 = vst [vmem:[%s1444_s20 + $0x48] sm:$0xff] %v839_v36 }
 0x2c1   : > { %v1132_v37 = vpop.f32.mrb[28].mxu0 }
 0x2c2   : > { %v860_v38 = vadd.f32 %v1132_v37, %v993_v12  ;;  %v851_v39 = vpop.f32.mrb[29].mxu0 }
 0x2c3   : > { %v852_v40 = vadd.f32 %v993_v12, %v851_v39  ;;  %v1133_v41 = vpop.f32.mrb[30].mxu0 }
 0x2c4   : > { %880 = vst [vmem:[%s1444_s20 + $0x70] sm:$0xff] %v860_v38  ;;  %v863_v42 = vadd.f32 %v1133_v41, %v993_v12  ;;  %v854_v43 = vpop.f32.mrb[31].mxu0 }
 0x2c5   : > { %878 = vst [vmem:[%s1444_s20 + $0x60] sm:$0xff] %v852_v40  ;;  %v855_v44 = vadd.f32 %v993_v12, %v854_v43 }
 0x2c6   : > { %881 = vst [vmem:[%s1444_s20 + $0x78] sm:$0xff] %v863_v42 }
 0x2c7   : > { %879 = vst [vmem:[%s1444_s20 + $0x68] sm:$0xff] %v855_v44 }
 0x2c8   : > { %1214 = shalt.err (!%p1211_p3)
}
 0x2c9   : > { %s1215_s16 = scalar_lea.hbm %s1464_s9, 2048  ;;  %s1219_s19 = scalar_lea.hbm %s1521_s7, 4096 }
 0x2ca   : > { %p1216_p4 = scmp.ne.s32.totalorder %s1464_s9, %s1215_s16  ;;  %p1220_p9 = scmp.lt.u32.totalorder %s1464_s9, %s1521_s7 }
 0x2cb   : > { %p1221_p10 = scmp.lt.u32.totalorder %s1219_s19, %s1215_s16  ;;  %p1223_p12 = scmp.lt.u32.totalorder %s1215_s16, %s1464_s9 }
 0x2cc   : > { %p1217_p7 = pnand %p1216_p4, %p1346_p5 }
 0x2cd   : > { %p1222_p11 = por %p1221_p10, %p1220_p9 }
 0x2ce   : > { %p1218_p8 = pneg %p1217_p7 }
 0x2cf   : > { %p1224_p13 = por %p1223_p12, %p1222_p11 }
 0x2d1   : > { %p1225_p0 = pnand %p1224_p13, %p1218_p8 }
 0x2d3   : > { %1228 = shalt.err (!%p1225_p0)
}
 0x2d4   : > { %s1266_s23 = smov 128   ;;  %s1267_s29 = smov 8  }
 0x2d5   : > { %1134 = dma.vmem_to_hbm [thread:$0]  (%p1346_p5), %s1466_s22, 2048, %s1464_s9, %s1473_s28, %s1266_s23, %s1266_s23, %s1267_s29  }
 0x2d6 PF: > { %p1140_p1 = scmp.ge.s32.totalorder %s1263_s27, 2  ;;  %s911_s13 = sand.u32 1, %s1251_s24  }
 0x2d7   : > { %s912_s8 = scalar_lea.sflag [#allocation3], %s911_s13 }
 0x2d8   : > { %p1137_p2 = pnand %p1140_p1, %p1350_p6 }
 0x2da   : > { %1246 = dma.done.wait (!%p1137_p2), %s912_s8, 2048  }
 0x2db   : > { %1248 = vsyncadd (!%p1137_p2), %s912_s8, 4294965248  ;;  %p17_p3 = scmp.ge.s32.totalorder %s1333_s30, 4   ;;  %s1524_s24 = smov %s1255_s25 }
 0x2dc   : > { %s1525_s25 = smov %s1259_s26  ;;  %s1526_s26 = smov %s1344_s10 }
 0x2dd   : > { %s1527_s27 = smov %s1333_s30  ;;  %19 = sbr.rel (!%p17_p3) target bundleno = 3 (0x3), region = 83 }
 0x2e4   :  { %917 = vsyncpa [#allocation3], 1 }
 0x2e5   :  { %919 = vsyncpa [#allocation3 + $0x1], 1 }

// kernel: tpu_custom_call.1
= control target key start
LH: loop header
LB: loop body
LE: loop exit
PB: predicated region body
PF: predicated region fallthrough
CT: control target
= control target key end

     0   :  { %12 = vsyncpa [#allocation3], 0  ;;  %s1514_s0 = inlined_call_operand.vmem [shape: bf16[256,32], index: 0, kind: input, shape index: {}]   ;;  %s1515_s1 = inlined_call_operand.vmem [shape: bf16[32,128], index: 1, kind: input, shape index: {}]   ;;  %s1516_s2 = inlined_call_operand.vmem [shape: f32[1,128], index: 2, kind: input, shape index: {}]   ;;  %s1517_s3 = inlined_call_operand.vmem [shape: bf16[128,128], index: 3, kind: input, shape index: {}]   ;;  %s1518_s4 = inlined_call_operand.vmem [shape: f32[1,128], index: 4, kind: input, shape index: {}]   ;;  %s1519_s5 = inlined_call_operand.vmem [shape: bf16[128,128], index: 5, kind: input, shape index: {}]   ;;  %s1520_s6 = inlined_call_operand.vmem [shape: f32[1,128], index: 6, kind: input, shape index: {}]   ;;  %s1521_s7 = inlined_call_operand.hbm [shape: f32[256,128], index: 7, kind: output, shape index: {}]  }
   0x1   :  { %14 = vsyncpa [#allocation3 + $0x1], 0  ;;  %s1308_s24 = smov 0   ;;  %s1310_s25 = smov 0  }
   0x2   :  { %s1312_s26 = smov 0   ;;  %s1314_s27 = smov 0  }
   0x3 LB: > { %s1329_s28 = sadd.s32 4294967295, %s1263_s27   ;;  %s958_s29 = sadd.s32 4294967294, %s1263_s27   ;;  %s1263_s27 = sphi %s1314_s27, %s1527_s27   ;;  %s1259_s26 = sphi %s1312_s26, %s1526_s26   ;;  %s1255_s25 = sphi %s1310_s25, %s1525_s25   ;;  %s1251_s24 = sphi %s1308_s24, %s1524_s24  }
   0x4   : > { %s1333_s30 = sadd.s32 1, %s1263_s27   ;;  %s179_s8 = sadd.s32 1, %s1259_s26 }
   0x5   : > { %s176_s9 = ssub.s32 %s1263_s27, %s1333_s30  ;;  %p189_p0 = scmp.ne.s32.totalorder %s1259_s26, %s1255_s25 }
   0x6   : > { %p177_p1 = scmp.eq.s32.totalorder %s176_s9, 0  ;;  %p190_p2 = scmp.eq.s32.totalorder %s1329_s28, 1 }
   0x7   : > { %p195_p3 = scmp.ne.s32.totalorder %s1255_s25, %s1251_s24  ;;  %p196_p4 = scmp.eq.s32.totalorder %s958_s29, 1 }
   0x8   : > { %s1344_s10 = scalar_select %p177_p1, %s1259_s26, %s179_s8  }
   0x9   : > { %p1346_p5 = por %p190_p2, %p189_p0  ;;  %p1350_p6 = por %p196_p4, %p195_p3 }
   0xa   : > { %p961_p7 = scmp.ge.s32.totalorder %s1263_s27, 1  ;;  %p241_p8 = scmp.lt.s32.totalorder %s1263_s27, 3 }
   0xc   : > { %p242_p9 = pnand %p961_p7, %p241_p8 }
   0xd   : > { %v1175_v0 = vld [vmem:[%s1515_s1] sm:$0xff] (!%p242_p9)   ;;  %s963_s15 = sshll.u32 (!%p242_p9), %s1329_s28, 4  ;;  %v1176_v1 = vld [vmem:[%s1515_s1 + $0x8] sm:$0xff] (!%p242_p9)   ;;  %vm360_vm0 = vcmask (!%p242_p9), 261120   ;;  %v1187_v4 = vld [vmem:[%s1517_s3 + $0x10] sm:$0xff] (!%p242_p9)   ;;  %s270_s16 = sand.u32 (!%p242_p9), 1, %s1255_s25  }
   0xe   : > { %245 = sbr.rel (%p242_p9) target bundleno = 726 (0x2d6), region = 48  ;;  %p274_p10 = scmp.lt.s32.totalorder (!%p242_p9), %s963_s15, 31  ;;  %1050 = vmatprep.subr.bf16.mxu0 (!%p242_p9), %v1175_v0  ;;  %v1185_v2 = vld [vmem:[%s1517_s3] sm:$0xff] (!%p242_p9)   ;;  %v1186_v3 = vld [vmem:[%s1517_s3 + $0x8] sm:$0xff] (!%p242_p9)   ;;  %v1188_v8 = vld [vmem:[%s1517_s3 + $0x18] sm:$0xff] (!%p242_p9)  }
   0xf   : > { %1051 = vmatpush3.bf16.msra.mxu0 (!%p242_p9), %v1175_v0  ;;  %1070 = vmatprep.subr.bf16.mxu1 (!%p242_p9), %v1185_v2  ;;  %v1189_v9 = vld [vmem:[%s1517_s3 + $0x20] sm:$0xff] (!%p242_p9)   ;;  %v1190_v12 = vld [vmem:[%s1517_s3 + $0x28] sm:$0xff] (!%p242_p9)   ;;  %v1191_v16 = vld [vmem:[%s1517_s3 + $0x30] sm:$0xff] (!%p242_p9)   ;;  %s962_s17 = sshll.u32 (!%p242_p9), %s270_s16, 7  ;;  %s1007_s21 = sshll.u32 (!%p242_p9), %s1329_s28, 11 }
  0x10   : > { %1052 = vmatprep.subr.bf16.mxu0 (!%p242_p9), %v1176_v1  ;;  %1071 = vmatpush3.bf16.msra.mxu1 (!%p242_p9), %v1185_v2  ;;  %v1192_v17 = vld [vmem:[%s1517_s3 + $0x38] sm:$0xff] (!%p242_p9)   ;;  %v1193_v18 = vld [vmem:[%s1519_s5] sm:$0xff] (!%p242_p9)   ;;  %v1194_v19 = vld [vmem:[%s1519_s5 + $0x8] sm:$0xff] (!%p242_p9)   ;;  %s1444_s20 = scalar_lea.vmem (!%p242_p9), [#allocation2], %s962_s17  ;;  %s1464_s9 = scalar_lea.hbm (!%p242_p9), %s1521_s7, %s1007_s21 }
  0x11   : > { %1072 = vmatprep.subr.bf16.mxu1 (!%p242_p9), %v1186_v3  ;;  %v1195_v20 = vld [vmem:[%s1519_s5 + $0x10] sm:$0xff] (!%p242_p9)   ;;  %v1196_v21 = vld [vmem:[%s1519_s5 + $0x18] sm:$0xff] (!%p242_p9)   ;;  %v1197_v22 = vld [vmem:[%s1519_s5 + $0x20] sm:$0xff] (!%p242_p9)   ;;  %s1473_s28 = scalar_lea.sflag (!%p242_p9), [#allocation3], %s270_s16 }
  0x12   : > { %v1198_v23 = vld [vmem:[%s1519_s5 + $0x28] sm:$0xff] (!%p242_p9)   ;;  %v965_v24 = vld [vmem:[%s1516_s2] ss:$0 sm:$0xff] (!%p242_p9) }
  0x13   : > { %1053 = vmatpush3.bf16.msra.mxu0 (!%p242_p9), %v1176_v1 }
  0x14   : > { %1073 = vmatpush3.bf16.msra.mxu1 (!%p242_p9), %v1186_v3  ;;  %1102 = vmatprep.subr.bf16.mxu0 (!%p242_p9), %v1193_v18 }
  0x15   : > { %s1529_s15 = smov (!%p274_p10, %s963_s15), 31  ;;  %1074 = vmatprep.subr.bf16.mxu1 %v1187_v4 }
  0x16   : > { %s964_s22 = sshll.u32 %s1529_s15, 2 }
  0x17   : > { %s1372_s8 = scalar_lea.vmem %s1514_s0, %s964_s22  ;;  %s896_s22 = sshll.u32 %s1444_s20, 4  ;;  %s1466_s22 = int_to_ptr.vmem [resolvable:$true] %s896_s22 }
  0x18   : > { %v1177_v5 = vld [vmem:[%s1372_s8] sm:$0xff]   ;;  %v1178_v6 = vld [vmem:[%s1372_s8 + $0x8] sm:$0xff]   ;;  %v1179_v7 = vld [vmem:[%s1372_s8 + $0x10] sm:$0xff]   ;;  %1075 = vmatpush3.bf16.msra.mxu1 %v1187_v4  ;;  %s1201_s13 = scalar_lea.vmem %s1466_s22, 2048 }
  0x19   : > { %1054 = vmatprep.mubr.msk.bf16.mxu0 %vm360_vm0, %v1177_v5  ;;  %v1180_v10 = vld [vmem:[%s1372_s8 + $0x18] sm:$0xff]   ;;  %1076 = vmatprep.subr.bf16.mxu1 %v1188_v8  ;;  %v1181_v11 = vld [vmem:[%s1372_s8 + $0x20] sm:$0xff]   ;;  %v1182_v13 = vld [vmem:[%s1372_s8 + $0x28] sm:$0xff]   ;;  %p1202_p11 = scmp.ne.s32.totalorder %s1466_s22, %s1201_s13 }
  0x1a   : > { %1055 = vmatmul.mubr.msk.bf16.vlgmr.msra.gmra.mrb[0].mxu0 %vm360_vm0, %v1178_v6  ;;  %v1183_v14 = vld [vmem:[%s1372_s8 + $0x30] sm:$0xff]   ;;  %v1184_v15 = vld [vmem:[%s1372_s8 + $0x38] sm:$0xff]   ;;  %s1265_s8 = smov [#allocation2]  }
  0x1b   : > { %1058 = vmatprep.mubr.msk.bf16.mxu0 %vm360_vm0, %v1179_v7  ;;  %1103 = vmatpush3.bf16.msra.mxu0 %v1193_v18  ;;  %v1200_v18 = vld [vmem:[%s1519_s5 + $0x38] sm:$0xff]   ;;  %p1203_p12 = pnand %p1202_p11, %p1346_p5  ;;  %s1205_s14 = sshll.u32 %s1265_s8, 4  ;;  %s1206_s14 = int_to_ptr.vmem [resolvable:$false] %s1205_s14 }
  0x1c   : > { %1077 = vmatpush3.bf16.msra.mxu1 %v1188_v8  ;;  %1104 = vmatprep.subr.bf16.mxu0 %v1194_v19  ;;  %s1207_s15 = scalar_lea.vmem %s1206_s14, 4096  ;;  %p1208_p0 = scmp.lt.s32.totalorder %s1466_s22, %s1206_s14 }
  0x1d   : > { %1078 = vmatprep.subr.bf16.mxu1 %v1189_v9  ;;  %p1204_p13 = pneg %p1203_p12  ;;  %p1209_p1 = scmp.lt.s32.totalorder %s1207_s15, %s1201_s13 }
  0x1f   : > { %1105 = vmatpush3.bf16.msra.mxu0 %v1194_v19  ;;  %v984_v19 = vld [vmem:[%s1518_s4] ss:$0 sm:$0xff]  ;;  %p1210_p2 = por %p1209_p1, %p1208_p0 }
  0x20   : > { %1079 = vmatpush3.bf16.msra.mxu1 %v1189_v9  ;;  %1106 = vmatprep.subr.bf16.mxu0 %v1195_v20 }
  0x21   : > { %1080 = vmatprep.subr.bf16.mxu1 %v1190_v12  ;;  %p1211_p3 = pnand %p1210_p2, %p1204_p13 }
  0x22   : > { %1059 = vmatmul.mubr.msk.bf16.gmra.mrb[4].mxu0 %vm360_vm0, %v1180_v10 }
  0x23   : > { %1062 = vmatprep.mubr.msk.bf16.mxu0 %vm360_vm0, %v1181_v11  ;;  %1107 = vmatpush3.bf16.msra.mxu0 %v1195_v20 }
  0x24   : > { %1081 = vmatpush3.bf16.msra.mxu1 %v1190_v12  ;;  %1108 = vmatprep.subr.bf16.mxu0 %v1196_v21 }
  0x25   : > { %1082 = vmatprep.subr.bf16.mxu1 %v1191_v16 }
  0x27   : > { %1109 = vmatpush3.bf16.msra.mxu0 %v1196_v21 }
  0x28   : > { %1083 = vmatpush3.bf16.msra.mxu1 %v1191_v16  ;;  %1110 = vmatprep.subr.bf16.mxu0 %v1197_v22 }
  0x29   : > { %1084 = vmatprep.subr.bf16.mxu1 %v1192_v17 }
  0x2a   : > { %1063 = vmatmul.mubr.msk.bf16.gmra.mrb[8].mxu0 %vm360_vm0, %v1182_v13 }
  0x2b   : > { %1066 = vmatprep.mubr.msk.bf16.mxu0 %vm360_vm0, %v1183_v14  ;;  %1111 = vmatpush3.bf16.msra.mxu0 %v1197_v22 }
  0x2c   : > { %1085 = vmatpush3.bf16.msra.mxu1 %v1192_v17  ;;  %1112 = vmatprep.subr.bf16.mxu0 %v1198_v23  ;;  %v1199_v17 = vld [vmem:[%s1519_s5 + $0x30] sm:$0xff]  }
  0x2f   : > { %1113 = vmatpush3.bf16.msra.mxu0 %v1198_v23 }
  0x30   : > { %1114 = vmatprep.subr.bf16.mxu0 %v1199_v17 }
  0x32   : > { %1067 = vmatmul.mubr.msk.bf16.gmra.mrb[12].mxu0 %vm360_vm0, %v1184_v15 }
  0x33   : > { %1115 = vmatpush3.bf16.msra.mxu0 %v1199_v17 }
  0x34   : > { %1116 = vmatprep.subr.bf16.mxu0 %v1200_v18 }
  0x37   : > { %1117 = vmatpush3.bf16.msra.mxu0 %v1200_v18 }
  0xed   : > { %v1056_v25 = vpop.f32.mrb[0].mxu0 }
  0xee   : > { %v428_v26 = vadd.f32 %v1056_v25, %v965_v24  ;;  %v419_v27 = vpop.f32.mrb[1].mxu0 }
  0xef   : > { %v420_v28 = vadd.f32 %v965_v24, %v419_v27  ;;  %v1057_v29 = vpop.f32.mrb[2].mxu0 }
  0xf0   : > { %v431_v30 = vadd.f32 %v1057_v29, %v965_v24  ;;  %v422_v31 = vpop.f32.mrb[3].mxu0  ;;  %v484_v33 = vmax.f32 %v428_v26, 0.0 }
  0xf1   : > { %v423_v32 = vadd.f32 %v965_v24, %v422_v31  ;;  %v482_v35 = vmax.f32 %v420_v28, 0.0 }
  0xf2   : > { %v485_v34 = vmax.f32 %v431_v30, 0.0 }
  0xf3   : > { %v483_v36 = vmax.f32 %v423_v32, 0.0 }
  0xf4   : > { %v499_v37 = vpack.c.bf16 %v485_v34, %v484_v33 }
  0xf5   : > { %v1060_v38 = vpop.f32.mrb[4].mxu0  ;;  %v498_v39 = vpack.c.bf16 %v483_v36, %v482_v35 }
  0xf6   : > { %v444_v40 = vadd.f32 %v1060_v38, %v965_v24  ;;  %v435_v41 = vpop.f32.mrb[5].mxu0 }
  0xf7   : > { %v436_v42 = vadd.f32 %v965_v24, %v435_v41  ;;  %v1061_v43 = vpop.f32.mrb[6].mxu0  ;;  %1086 = vmatprep.mubr.bf16.mxu1 %v498_v39 }
  0xf8   : > { %v447_v44 = vadd.f32 %v1061_v43, %v965_v24  ;;  %v438_v45 = vpop.f32.mrb[7].mxu0  ;;  %1087 = vmatmul.mubr.bf16.vlgmr.msra.gmra.mrb[0].mxu1 %v499_v37  ;;  %v488_v47 = vmax.f32 %v444_v40, 0.0 }
  0xf9   : > { %v439_v46 = vadd.f32 %v965_v24, %v438_v45  ;;  %v486_v49 = vmax.f32 %v436_v42, 0.0 }
  0xfa   : > { %v489_v48 = vmax.f32 %v447_v44, 0.0 }
  0xfb   : > { %v487_v50 = vmax.f32 %v439_v46, 0.0 }
  0xfc   : > { %v501_v51 = vpack.c.bf16 %v489_v48, %v488_v47 }
  0xfd   : > { %v500_v52 = vpack.c.bf16 %v487_v50, %v486_v49  ;;  %v1064_v53 = vpop.f32.mrb[8].mxu0 }
  0xfe   : > { %v460_v54 = vadd.f32 %v1064_v53, %v965_v24  ;;  %v451_v55 = vpop.f32.mrb[9].mxu0 }
  0xff   : > { %v452_v56 = vadd.f32 %v965_v24, %v451_v55  ;;  %v1065_v57 = vpop.f32.mrb[10].mxu0  ;;  %1090 = vmatprep.mubr.bf16.mxu1 %v500_v52 }
 0x100   : > { %v463_v58 = vadd.f32 %v1065_v57, %v965_v24  ;;  %v454_v59 = vpop.f32.mrb[11].mxu0  ;;  %1091 = vmatmul.mubr.bf16.gmra.mrb[4].mxu1 %v501_v51  ;;  %v492_v61 = vmax.f32 %v460_v54, 0.0 }
 0x101   : > { %v455_v60 = vadd.f32 %v965_v24, %v454_v59  ;;  %v490_v63 = vmax.f32 %v452_v56, 0.0 }
 0x102   : > { %v493_v62 = vmax.f32 %v463_v58, 0.0 }
 0x103   : > { %v491_v0 = vmax.f32 %v455_v60, 0.0 }
 0x104   : > { %v503_v1 = vpack.c.bf16 %v493_v62, %v492_v61 }
 0x105   : > { %v502_v2 = vpack.c.bf16 %v491_v0, %v490_v63  ;;  %v1068_v3 = vpop.f32.mrb[12].mxu0 }
 0x106   : > { %v476_v4 = vadd.f32 %v1068_v3, %v965_v24  ;;  %v467_v5 = vpop.f32.mrb[13].mxu0 }
 0x107   : > { %v468_v6 = vadd.f32 %v965_v24, %v467_v5  ;;  %v1069_v7 = vpop.f32.mrb[14].mxu0  ;;  %1094 = vmatprep.mubr.bf16.mxu1 %v502_v2 }
 0x108   : > { %v479_v8 = vadd.f32 %v1069_v7, %v965_v24  ;;  %v470_v9 = vpop.f32.mrb[15].mxu0  ;;  %1095 = vmatmul.mubr.bf16.gmra.mrb[8].mxu1 %v503_v1  ;;  %v496_v11 = vmax.f32 %v476_v4, 0.0 }
 0x109   : > { %v471_v10 = vadd.f32 %v965_v24, %v470_v9  ;;  %v494_v13 = vmax.f32 %v468_v6, 0.0 }
 0x10a   : > { %v497_v12 = vmax.f32 %v479_v8, 0.0 }
 0x10b   : > { %v495_v14 = vmax.f32 %v471_v10, 0.0 }
 0x10c   : > { %v505_v15 = vpack.c.bf16 %v497_v12, %v496_v11  ;;  %v993_v12 = vld [vmem:[%s1520_s6] ss:$0 sm:$0xff] }
 0x10d   : > { %v504_v16 = vpack.c.bf16 %v495_v14, %v494_v13 }
 0x10f   : > { %1098 = vmatprep.mubr.bf16.mxu1 %v504_v16 }
 0x110   : > { %1099 = vmatmul.mubr.bf16.gmra.mrb[12].mxu1 %v505_v15 }
 0x1cb   : > { %v1088_v20 = vpop.f32.mrb[0].mxu1 }
 0x1cc   : > { %v620_v21 = vadd.f32 %v1088_v20, %v984_v19  ;;  %v611_v22 = vpop.f32.mrb[1].mxu1 }
 0x1cd   : > { %v612_v23 = vadd.f32 %v984_v19, %v611_v22  ;;  %v1089_v24 = vpop.f32.mrb[2].mxu1 }
 0x1ce   : > { %v623_v25 = vadd.f32 %v1089_v24, %v984_v19  ;;  %v614_v26 = vpop.f32.mrb[3].mxu1  ;;  %v676_v28 = vmax.f32 %v620_v21, 0.0 }
 0x1cf   : > { %v615_v27 = vadd.f32 %v984_v19, %v614_v26  ;;  %v674_v30 = vmax.f32 %v612_v23, 0.0 }
 0x1d0   : > { %v677_v29 = vmax.f32 %v623_v25, 0.0 }
 0x1d1   : > { %v675_v31 = vmax.f32 %v615_v27, 0.0 }
 0x1d2   : > { %v691_v32 = vpack.c.bf16 %v677_v29, %v676_v28 }
 0x1d3   : > { %v690_v33 = vpack.c.bf16 %v675_v31, %v674_v30  ;;  %v1092_v34 = vpop.f32.mrb[4].mxu1 }
 0x1d4   : > { %v636_v35 = vadd.f32 %v1092_v34, %v984_v19  ;;  %v627_v36 = vpop.f32.mrb[5].mxu1 }
 0x1d5   : > { %v628_v37 = vadd.f32 %v984_v19, %v627_v36  ;;  %v1093_v38 = vpop.f32.mrb[6].mxu1  ;;  %1118 = vmatprep.mubr.bf16.mxu0 %v690_v33 }
 0x1d6   : > { %v639_v39 = vadd.f32 %v1093_v38, %v984_v19  ;;  %v630_v40 = vpop.f32.mrb[7].mxu1  ;;  %1119 = vmatmul.mubr.bf16.vlgmr.msra.gmra.mrb[16].mxu0 %v691_v32  ;;  %v680_v42 = vmax.f32 %v636_v35, 0.0 }
 0x1d7   : > { %v631_v41 = vadd.f32 %v984_v19, %v630_v40  ;;  %v678_v44 = vmax.f32 %v628_v37, 0.0 }
 0x1d8   : > { %v681_v43 = vmax.f32 %v639_v39, 0.0 }
 0x1d9   : > { %v679_v45 = vmax.f32 %v631_v41, 0.0 }
 0x1da   : > { %v693_v46 = vpack.c.bf16 %v681_v43, %v680_v42 }
 0x1db   : > { %v692_v47 = vpack.c.bf16 %v679_v45, %v678_v44  ;;  %v1096_v48 = vpop.f32.mrb[8].mxu1 }
 0x1dc   : > { %v652_v49 = vadd.f32 %v1096_v48, %v984_v19  ;;  %v643_v50 = vpop.f32.mrb[9].mxu1 }
 0x1dd   : > { %v644_v51 = vadd.f32 %v984_v19, %v643_v50  ;;  %v1097_v52 = vpop.f32.mrb[10].mxu1  ;;  %1122 = vmatprep.mubr.bf16.mxu0 %v692_v47 }
 0x1de   : > { %v655_v53 = vadd.f32 %v1097_v52, %v984_v19  ;;  %v646_v54 = vpop.f32.mrb[11].mxu1  ;;  %1123 = vmatmul.mubr.bf16.gmra.mrb[20].mxu0 %v693_v46  ;;  %v684_v56 = vmax.f32 %v652_v49, 0.0 }
 0x1df   : > { %v647_v55 = vadd.f32 %v984_v19, %v646_v54  ;;  %v682_v58 = vmax.f32 %v644_v51, 0.0 }
 0x1e0   : > { %v685_v57 = vmax.f32 %v655_v53, 0.0 }
 0x1e1   : > { %v683_v59 = vmax.f32 %v647_v55, 0.0 }
 0x1e2   : > { %v695_v60 = vpack.c.bf16 %v685_v57, %v684_v56 }
 0x1e3   : > { %v694_v61 = vpack.c.bf16 %v683_v59, %v682_v58  ;;  %v1100_v62 = vpop.f32.mrb[12].mxu1 }
 0x1e4   : > { %v668_v63 = vadd.f32 %v1100_v62, %v984_v19  ;;  %v659_v0 = vpop.f32.mrb[13].mxu1 }
 0x1e5   : > { %v660_v1 = vadd.f32 %v984_v19, %v659_v0  ;;  %v1101_v2 = vpop.f32.mrb[14].mxu1  ;;  %1126 = vmatprep.mubr.bf16.mxu0 %v694_v61 }
 0x1e6   : > { %v671_v3 = vadd.f32 %v1101_v2, %v984_v19  ;;  %v662_v4 = vpop.f32.mrb[15].mxu1  ;;  %1127 = vmatmul.mubr.bf16.gmra.mrb[24].mxu0 %v695_v60  ;;  %v688_v6 = vmax.f32 %v668_v63, 0.0 }
 0x1e7   : > { %v663_v5 = vadd.f32 %v984_v19, %v662_v4  ;;  %v686_v8 = vmax.f32 %v660_v1, 0.0 }
 0x1e8   : > { %v689_v7 = vmax.f32 %v671_v3, 0.0 }
 0x1e9   : > { %v687_v9 = vmax.f32 %v663_v5, 0.0 }
 0x1ea   : > { %v697_v10 = vpack.c.bf16 %v689_v7, %v688_v6 }
 0x1eb   : > { %v696_v11 = vpack.c.bf16 %v687_v9, %v686_v8 }
 0x1ed   : > { %1130 = vmatprep.mubr.bf16.mxu0 %v696_v11 }
 0x1ee   : > { %1131 = vmatmul.mubr.bf16.gmra.mrb[28].mxu0 %v697_v10 }
 0x2a9   : > { %v1120_v13 = vpop.f32.mrb[16].mxu0 }
 0x2aa   : > { %v812_v14 = vadd.f32 %v1120_v13, %v993_v12  ;;  %v803_v15 = vpop.f32.mrb[17].mxu0 }
 0x2ab   : > { %v804_v16 = vadd.f32 %v993_v12, %v803_v15  ;;  %v1121_v17 = vpop.f32.mrb[18].mxu0 }
 0x2ac   : > { %868 = vst [vmem:[%s1444_s20 + $0x10] sm:$0xff] %v812_v14  ;;  %v815_v18 = vadd.f32 %v1121_v17, %v993_v12  ;;  %v806_v19 = vpop.f32.mrb[19].mxu0 }
 0x2ad   : > { %866 = vst [vmem:[%s1444_s20] sm:$0xff] %v804_v16  ;;  %v807_v20 = vadd.f32 %v993_v12, %v806_v19 }
 0x2ae   : > { %869 = vst [vmem:[%s1444_s20 + $0x18] sm:$0xff] %v815_v18 }
 0x2af   : > { %867 = vst [vmem:[%s1444_s20 + $0x8] sm:$0xff] %v807_v20 }
 0x2b1   : > { %v1124_v21 = vpop.f32.mrb[20].mxu0 }
 0x2b2   : > { %v828_v22 = vadd.f32 %v1124_v21, %v993_v12  ;;  %v819_v23 = vpop.f32.mrb[21].mxu0 }
 0x2b3   : > { %v820_v24 = vadd.f32 %v993_v12, %v819_v23  ;;  %v1125_v25 = vpop.f32.mrb[22].mxu0 }
 0x2b4   : > { %872 = vst [vmem:[%s1444_s20 + $0x30] sm:$0xff] %v828_v22  ;;  %v831_v26 = vadd.f32 %v1125_v25, %v993_v12  ;;  %v822_v27 = vpop.f32.mrb[23].mxu0 }
 0x2b5   : > { %870 = vst [vmem:[%s1444_s20 + $0x20] sm:$0xff] %v820_v24  ;;  %v823_v28 = vadd.f32 %v993_v12, %v822_v27 }
 0x2b6   : > { %873 = vst [vmem:[%s1444_s20 + $0x38] sm:$0xff] %v831_v26 }
 0x2b7   : > { %871 = vst [vmem:[%s1444_s20 + $0x28] sm:$0xff] %v823_v28 }
 0x2b9   : > { %v1128_v29 = vpop.f32.mrb[24].mxu0 }
 0x2ba   : > { %v844_v30 = vadd.f32 %v1128_v29, %v993_v12  ;;  %v835_v31 = vpop.f32.mrb[25].mxu0 }
 0x2bb   : > { %v836_v32 = vadd.f32 %v993_v12, %v835_v31  ;;  %v1129_v33 = vpop.f32.mrb[26].mxu0 }
 0x2bc   : > { %876 = vst [vmem:[%s1444_s20 + $0x50] sm:$0xff] %v844_v30  ;;  %v847_v34 = vadd.f32 %v1129_v33, %v993_v12  ;;  %v838_v35 = vpop.f32.mrb[27].mxu0 }
 0x2bd   : > { %874 = vst [vmem:[%s1444_s20 + $0x40] sm:$0xff] %v836_v32  ;;  %v839_v36 = vadd.f32 %v993_v12, %v838_v35 }
 0x2be   : > { %877 = vst [vmem:[%s1444_s20 + $0x58] sm:$0xff] %v847_v34 }
 0x2bf   : > { %875 = vst [vmem:[%s1444_s20 + $0x48] sm:$0xff] %v839_v36 }
 0x2c1   : > { %v1132_v37 = vpop.f32.mrb[28].mxu0 }
 0x2c2   : > { %v860_v38 = vadd.f32 %v1132_v37, %v993_v12  ;;  %v851_v39 = vpop.f32.mrb[29].mxu0 }
 0x2c3   : > { %v852_v40 = vadd.f32 %v993_v12, %v851_v39  ;;  %v1133_v41 = vpop.f32.mrb[30].mxu0 }
 0x2c4   : > { %880 = vst [vmem:[%s1444_s20 + $0x70] sm:$0xff] %v860_v38  ;;  %v863_v42 = vadd.f32 %v1133_v41, %v993_v12  ;;  %v854_v43 = vpop.f32.mrb[31].mxu0 }
 0x2c5   : > { %878 = vst [vmem:[%s1444_s20 + $0x60] sm:$0xff] %v852_v40  ;;  %v855_v44 = vadd.f32 %v993_v12, %v854_v43 }
 0x2c6   : > { %881 = vst [vmem:[%s1444_s20 + $0x78] sm:$0xff] %v863_v42 }
 0x2c7   : > { %879 = vst [vmem:[%s1444_s20 + $0x68] sm:$0xff] %v855_v44 }
 0x2c8   : > { %1214 = shalt.err (!%p1211_p3)
}
 0x2c9   : > { %s1215_s16 = scalar_lea.hbm %s1464_s9, 2048  ;;  %s1219_s19 = scalar_lea.hbm %s1521_s7, 4096 }
 0x2ca   : > { %p1216_p4 = scmp.ne.s32.totalorder %s1464_s9, %s1215_s16  ;;  %p1220_p9 = scmp.lt.u32.totalorder %s1464_s9, %s1521_s7 }
 0x2cb   : > { %p1221_p10 = scmp.lt.u32.totalorder %s1219_s19, %s1215_s16  ;;  %p1223_p12 = scmp.lt.u32.totalorder %s1215_s16, %s1464_s9 }
 0x2cc   : > { %p1217_p7 = pnand %p1216_p4, %p1346_p5 }
 0x2cd   : > { %p1222_p11 = por %p1221_p10, %p1220_p9 }
 0x2ce   : > { %p1218_p8 = pneg %p1217_p7 }
 0x2cf   : > { %p1224_p13 = por %p1223_p12, %p1222_p11 }
 0x2d1   : > { %p1225_p0 = pnand %p1224_p13, %p1218_p8 }
 0x2d3   : > { %1228 = shalt.err (!%p1225_p0)
}
 0x2d4   : > { %s1266_s23 = smov 128   ;;  %s1267_s29 = smov 8  }
 0x2d5   : > { %1134 = dma.vmem_to_hbm [thread:$0]  (%p1346_p5), %s1466_s22, 2048, %s1464_s9, %s1473_s28, %s1266_s23, %s1266_s23, %s1267_s29  }
 0x2d6 PF: > { %p1140_p1 = scmp.ge.s32.totalorder %s1263_s27, 2  ;;  %s911_s13 = sand.u32 1, %s1251_s24  }
 0x2d7   : > { %s912_s8 = scalar_lea.sflag [#allocation3], %s911_s13 }
 0x2d8   : > { %p1137_p2 = pnand %p1140_p1, %p1350_p6 }
 0x2da   : > { %1246 = dma.done.wait (!%p1137_p2), %s912_s8, 2048  }
 0x2db   : > { %1248 = vsyncadd (!%p1137_p2), %s912_s8, 4294965248  ;;  %p17_p3 = scmp.ge.s32.totalorder %s1333_s30, 4   ;;  %s1524_s24 = smov %s1255_s25 }
 0x2dc   : > { %s1525_s25 = smov %s1259_s26  ;;  %s1526_s26 = smov %s1344_s10 }
 0x2dd   : > { %s1527_s27 = smov %s1333_s30  ;;  %19 = sbr.rel (!%p17_p3) target bundleno = 3 (0x3), region = 83 }
 0x2e4   :  { %917 = vsyncpa [#allocation3], 1 }
 0x2e5   :  { %919 = vsyncpa [#allocation3 + $0x1], 1 }

</bundles_post_ra>
